<compile_context>
chip_gen: v6e
topology: v6e:2x2x1
jax: 0.10.0
libtpu: 0.0.40
codegen_flags: <defaults>
</compile_context>

<pallas_src>
import functools

import jax
import jax.numpy as jnp
from jax import lax
from jax.experimental import pallas as pl
from jax.experimental.pallas import tpu as pltpu


def _round_up(x, m):
    return ((x + m - 1) // m) * m


def _margin_ce_kernel(logits_ref, zraw_ref, tadj_ref, out_ref, m_ref, l_ref,
                      *, n_rows, n_cols, mask_cols):
    """Online logsumexp over raw logits; margin correction applied at finalize."""
    i = pl.program_id(0)            # batch-tile index ('parallel')
    k = pl.program_id(1)            # class-tile index ('arbitrary', innermost)
    num_k = pl.num_programs(1)
    tile_n, tile_c = logits_ref.shape

    @pl.when(k == 0)
    def _init():
        m_ref[...] = jnp.full(m_ref.shape, -jnp.inf, dtype=m_ref.dtype)
        l_ref[...] = jnp.zeros(l_ref.shape, dtype=l_ref.dtype)

    logits = logits_ref[...].astype(jnp.float32)          # (tile_n, tile_c)

    def _online_update(vals):
        m_prev = m_ref[...]
        m_new = jnp.maximum(m_prev, jnp.max(vals, axis=-1, keepdims=True))
        alpha = jnp.exp(m_prev - m_new)
        l_ref[...] = alpha * l_ref[...] + jnp.sum(jnp.exp(vals - m_new),
                                                  axis=-1, keepdims=True)
        m_ref[...] = m_new

    if mask_cols:
        # Only the last class tile can contain out-of-bounds lanes; keep the
        # compare + select off the hot path of every other tile.
        @pl.when(k < num_k - 1)
        def _hot():
            _online_update(logits)

        @pl.when(k == num_k - 1)
        def _tail():
            col = k * tile_c + lax.broadcasted_iota(jnp.int32,
                                                    (tile_n, tile_c), 1)
            _online_update(jnp.where(col < n_cols, logits, -jnp.inf))
    else:
        _online_update(logits)

    @pl.when(k == num_k - 1)
    def _finalize():
        m = m_ref[...]                                     # (tile_n, 1)
        z = zraw_ref[...]                                  # raw target logit
        t = tadj_ref[...]                                  # z - margin[target]
        # Swap the raw target term for the margin-adjusted one inside the sum.
        l_adj = l_ref[...] - jnp.exp(z - m) + jnp.exp(t - m)
        per_sample = m + jnp.log(l_adj) - t
        row = i * tile_n + lax.broadcasted_iota(jnp.int32, (tile_n, 1), 0)
        per_sample = jnp.where(row < n_rows, per_sample, 0.0)   # mask row tail
        # Lane-dense (1, 128) partial-sum block; reduced in the wrapper.
        out_ref[...] = jnp.full(out_ref.shape, jnp.sum(per_sample),
                                dtype=jnp.float32)


def _vmem_capacity_bytes():
    try:
        info = pltpu.get_tpu_info()
        for attr in ("vmem_capacity_bytes", "vmem_size_bytes", "vmem_bytes"):
            val = getattr(info, attr, None)
            if val:
                return int(val)
    except Exception:
        pass
    return 64 * 1024 * 1024            # conservative fallback (v7x-sized VMEM)


def _choose_tiles(n, c, itemsize, buf_budget_bytes):
    """Pick (tile_n, tile_c) for the streamed logits block (native dtype)."""
    max_elems = max(buf_budget_bytes // itemsize, 8 * 128)
    if c * 8 <= max_elems:
        tile_c = c                                   # single pass over classes
    else:
        tile_c = max(128, min(8192, ((max_elems // 8) // 128) * 128))
    tile_n = max(8, min(512, ((max_elems // tile_c) // 8) * 8))
    tile_n = min(tile_n, _round_up(n, 8))
    # Keep >= 2 row blocks when the batch allows it so the 'parallel' axis can
    # shard across both TensorCores on v7x (cheap on v5e/v6e).
    if n > 8 and pl.cdiv(n, tile_n) < 2:
        tile_n = max(8, _round_up(pl.cdiv(n, 2), 8))
    return tile_n, tile_c


def margin_based_cross_entropy_loss(logits, targets, class_counts, delta,
                                    reduction="mean", *, tile_n=None,
                                    tile_c=None):
    """JAX/Pallas equivalent of MarginBasedCrossEntropyLoss.forward."""
    if reduction not in ("mean", "sum"):
        raise ValueError(f"unsupported reduction: {reduction}")

    n, c = logits.shape
    targets = targets.astype(jnp.int32)

    # margins = delta * min(counts^0.25) / counts^0.25   (module __init__ glue)
    counts = class_counts.astype(jnp.float32)
    quarter = jnp.power(counts, 0.25)
    margins = (delta * (jnp.min(quarter) / quarter)).astype(jnp.float32)

    # Per-row gathers (N elements): raw target logit and its margin-adjusted
    # value.  They carry all target/margin information, so the streamed kernel
    # never touches one-hots or the margins vector.
    z_raw = jnp.take_along_axis(logits, targets[:, None], axis=1)
    z_raw = z_raw.astype(jnp.float32)                        # (n, 1)
    t_adj = z_raw - margins[targets][:, None]                # (n, 1)

    # ---- generation-aware tile / VMEM budget ------------------------------
    vmem_cap = _vmem_capacity_bytes()
    if vmem_cap >= 100 * 1024 * 1024:          # v5e / v6e (128 MiB VMEM)
        buf_budget = 8 * 1024 * 1024
    else:                                      # v7x (64 MiB VMEM)
        buf_budget = 4 * 1024 * 1024
    vmem_limit = int(min(96 * 1024 * 1024, (vmem_cap * 3) // 4))

    auto_tn, auto_tc = _choose_tiles(n, c, logits.dtype.itemsize, buf_budget)
    tile_n = auto_tn if tile_n is None else min(tile_n, _round_up(n, 8))
    tile_c = auto_tc if tile_c is None else min(tile_c, c)

    num_n_blocks = pl.cdiv(n, tile_n)
    num_c_blocks = pl.cdiv(c, tile_c)
    mask_cols = (c % tile_c) != 0

    kernel = functools.partial(_margin_ce_kernel, n_rows=n, n_cols=c,
                               mask_cols=mask_cols)

    out = pl.pallas_call(
        kernel,
        out_shape=jax.ShapeDtypeStruct((1, 128 * num_n_blocks), jnp.float32),
        grid=(num_n_blocks, num_c_blocks),
        in_specs=[
            # logits stream in their native dtype (no pre-upcast, no pre-pad)
            pl.BlockSpec((tile_n, tile_c), lambda i, k: (i, k)),
            pl.BlockSpec((tile_n, 1), lambda i, k: (i, 0)),   # raw target logit
            pl.BlockSpec((tile_n, 1), lambda i, k: (i, 0)),   # adjusted target logit
        ],
        out_specs=pl.BlockSpec((1, 128), lambda i, k: (0, i)),
        scratch_shapes=[
            pltpu.VMEM((tile_n, 1), jnp.float32),   # running row max m
            pltpu.VMEM((tile_n, 1), jnp.float32),   # running exp-sum l
        ],
        compiler_params=pltpu.CompilerParams(
            dimension_semantics=("parallel", "arbitrary"),
            vmem_limit_bytes=vmem_limit),
    )(logits, z_raw, t_adj)

    partials = out.reshape(num_n_blocks, 128)[:, 0]
    total = jnp.sum(partials)
    if reduction == "mean":
        total = total / jnp.float32(n)
    return total


def _reference(logits, targets, class_counts, delta, reduction="mean"):
    counts = class_counts.astype(jnp.float32)
    quarter = jnp.power(counts, 0.25)
    margins = delta * (jnp.min(quarter) / quarter)
    onehot = jax.nn.one_hot(targets, logits.shape[1], dtype=jnp.float32)
    adjusted = logits.astype(jnp.float32) - onehot * margins[targets][:, None]
    logp = jax.nn.log_softmax(adjusted, axis=-1)
    per = -jnp.take_along_axis(logp, targets[:, None], axis=-1)[:, 0]
    return jnp.mean(per) if reduction == "mean" else jnp.sum(per)


if __name__ == "__main__":
    key = jax.random.PRNGKey(0)
    k1, k2, k3, k4, k5, k6, k7 = jax.random.split(key, 7)
    delta = 0.5

    # Case 1: aligned small shapes, f32 logits, mean reduction.
    N, C = 8, 16
    logits = jax.random.normal(k1, (N, C), dtype=jnp.float32)
    targets = jax.random.randint(k2, (N,), 0, C, dtype=jnp.int32)
    counts = jnp.arange(C, dtype=jnp.float32) * 7.0 + 5.0

    loss = margin_based_cross_entropy_loss(logits, targets, counts, delta, "mean")
    loss = jax.block_until_ready(loss)
    ref = _reference(logits, targets, counts, delta, "mean")
    assert jnp.allclose(loss, ref, rtol=1e-5, atol=1e-5), (loss, ref)

    # Case 2: ragged batch (N % 8 != 0), bf16 logits streamed as bf16, sum red.
    N2, C2 = 10, 20
    logits2 = jax.random.normal(k3, (N2, C2), dtype=jnp.float32).astype(jnp.bfloat16)
    targets2 = jax.random.randint(k4, (N2,), 0, C2, dtype=jnp.int32)
    counts2 = jnp.arange(C2, dtype=jnp.float32) * 3.0 + 2.0

    loss2 = margin_based_cross_entropy_loss(logits2, targets2, counts2, delta, "sum")
    loss2 = jax.block_until_ready(loss2)
    ref2 = _reference(logits2.astype(jnp.float32), targets2, counts2, delta, "sum")
    assert jnp.allclose(loss2, ref2, rtol=1e-4, atol=1e-4), (loss2, ref2)

    # Case 3: forced class tiling (exercises the masked last-class-tile path
    # and multiple ragged row blocks) at small scale.
    N3, C3 = 12, 200
    logits3 = jax.random.normal(k5, (N3, C3), dtype=jnp.float32)
    targets3 = jax.random.randint(k6, (N3,), 0, C3, dtype=jnp.int32)
    counts3 = jax.random.uniform(k7, (C3,), minval=1.0, maxval=100.0)

    loss3 = margin_based_cross_entropy_loss(logits3, targets3, counts3, delta,
                                            "mean", tile_n=8, tile_c=128)
    loss3 = jax.block_until_ready(loss3)
    ref3 = _reference(logits3, targets3, counts3, delta, "mean")
    assert jnp.allclose(loss3, ref3, rtol=1e-5, atol=1e-5), (loss3, ref3)

    print("KERNEL_OK")
</pallas_src>

<mosaic_0001>
module attributes {stable_mosaic.version = 11 : i64} {
  func.func @_margin_ce_kernel(%arg0: i32, %arg1: i32, %arg2: memref<8x16xf32, #tpu.memory_space<vmem>>, %arg3: memref<8x1xf32, #tpu.memory_space<vmem>>, %arg4: memref<8x1xf32, #tpu.memory_space<vmem>>, %arg5: memref<1x128xf32, #tpu.memory_space<vmem>>, %arg6: memref<8x1xf32, #tpu.memory_space<vmem>>, %arg7: memref<8x1xf32, #tpu.memory_space<vmem>>) attributes {dimension_semantics = [#tpu.dimension_semantics<parallel>, #tpu.dimension_semantics<arbitrary>], iteration_bounds = array<i64: 1, 1>, scalar_prefetch = 0 : i64, scratch_operands = 2 : i64, tpu.core_type = #tpu.core_type<tc>, window_params = [{transform_indices = @transform_0, window_bounds = array<i64: 8, 16>}, {transform_indices = @transform_1, window_bounds = array<i64: 8, 1>}, {transform_indices = @transform_2, window_bounds = array<i64: 8, 1>}, {transform_indices = @transform_3, window_bounds = array<i64: 1, 128>}]} {
    %c0_i32 = arith.constant 0 : i32
    %0 = arith.cmpi eq, %arg1, %c0_i32 : i32
    %1 = arith.extui %0 : i1 to i32
    %c0_i32_0 = arith.constant 0 : i32
    %2 = arith.cmpi ne, %1, %c0_i32_0 : i32
    scf.if %2 {
      %cst_13 = arith.constant 0xFF800000 : f32
      %23 = vector.broadcast %cst_13 : f32 to vector<8x1xf32>
      %c0_14 = arith.constant 0 : index
      %c0_15 = arith.constant 0 : index
      %24 = vector.load %arg6[%c0_14, %c0_15] : memref<8x1xf32, #tpu.memory_space<vmem>>, vector<8x1xf32>
      tpu.vector_store %arg6[%c0_14, %c0_15], %23 {strides = array<i32>} : memref<8x1xf32, #tpu.memory_space<vmem>>, vector<8x1xf32>,
      %cst_16 = arith.constant 0.000000e+00 : f32
      %25 = vector.broadcast %cst_16 : f32 to vector<8x1xf32>
      %c0_17 = arith.constant 0 : index
      %c0_18 = arith.constant 0 : index
      %26 = vector.load %arg7[%c0_17, %c0_18] : memref<8x1xf32, #tpu.memory_space<vmem>>, vector<8x1xf32>
      tpu.vector_store %arg7[%c0_17, %c0_18], %25 {strides = array<i32>} : memref<8x1xf32, #tpu.memory_space<vmem>>, vector<8x1xf32>,
    } else {
    }
    %c0 = arith.constant 0 : index
    %c0_1 = arith.constant 0 : index
    %3 = vector.load %arg2[%c0, %c0_1] : memref<8x16xf32, #tpu.memory_space<vmem>>, vector<8x16xf32>
    %c0_2 = arith.constant 0 : index
    %c0_3 = arith.constant 0 : index
    %4 = vector.load %arg6[%c0_2, %c0_3] : memref<8x1xf32, #tpu.memory_space<vmem>>, vector<8x1xf32>
    %cst = arith.constant dense<0xFF800000> : vector<8xf32>
    %5 = vector.multi_reduction <maximumf>, %3, %cst [1] : vector<8x16xf32> to vector<8xf32>
    %6 = vector.shape_cast %5 : vector<8xf32> to vector<8x1xf32>
    %7 = arith.maximumf %4, %6 : vector<8x1xf32>
    %8 = arith.subf %4, %7 : vector<8x1xf32>
    %9 = math.exp %8 : vector<8x1xf32>
    %c0_4 = arith.constant 0 : index
    %c0_5 = arith.constant 0 : index
    %10 = vector.load %arg7[%c0_4, %c0_5] : memref<8x1xf32, #tpu.memory_space<vmem>>, vector<8x1xf32>
    %11 = arith.mulf %9, %10 : vector<8x1xf32>
    %12 = vector.broadcast %7 : vector<8x1xf32> to vector<8x16xf32>
    %13 = arith.subf %3, %12 : vector<8x16xf32>
    %14 = math.exp %13 : vector<8x16xf32>
    %cst_6 = arith.constant dense<0.000000e+00> : vector<8xf32>
    %15 = vector.multi_reduction <add>, %14, %cst_6 [1] : vector<8x16xf32> to vector<8xf32>
    %16 = vector.shape_cast %15 : vector<8xf32> to vector<8x1xf32>
    %17 = arith.addf %11, %16 : vector<8x1xf32>
    %c0_7 = arith.constant 0 : index
    %c0_8 = arith.constant 0 : index
    %18 = vector.load %arg7[%c0_7, %c0_8] : memref<8x1xf32, #tpu.memory_space<vmem>>, vector<8x1xf32>
    tpu.vector_store %arg7[%c0_7, %c0_8], %17 {strides = array<i32>} : memref<8x1xf32, #tpu.memory_space<vmem>>, vector<8x1xf32>,
    %c0_9 = arith.constant 0 : index
    %c0_10 = arith.constant 0 : index
    %19 = vector.load %arg6[%c0_9, %c0_10] : memref<8x1xf32, #tpu.memory_space<vmem>>, vector<8x1xf32>
    tpu.vector_store %arg6[%c0_9, %c0_10], %7 {strides = array<i32>} : memref<8x1xf32, #tpu.memory_space<vmem>>, vector<8x1xf32>,
    %c0_i32_11 = arith.constant 0 : i32
    %20 = arith.cmpi eq, %arg1, %c0_i32_11 : i32
    %21 = arith.extui %20 : i1 to i32
    %c0_i32_12 = arith.constant 0 : i32
    %22 = arith.cmpi ne, %21, %c0_i32_12 : i32
    scf.if %22 {
      %c0_13 = arith.constant 0 : index
      %c0_14 = arith.constant 0 : index
      %23 = vector.load %arg6[%c0_13, %c0_14] : memref<8x1xf32, #tpu.memory_space<vmem>>, vector<8x1xf32>
      %c0_15 = arith.constant 0 : index
      %c0_16 = arith.constant 0 : index
      %24 = vector.load %arg3[%c0_15, %c0_16] : memref<8x1xf32, #tpu.memory_space<vmem>>, vector<8x1xf32>
      %c0_17 = arith.constant 0 : index
      %c0_18 = arith.constant 0 : index
      %25 = vector.load %arg4[%c0_17, %c0_18] : memref<8x1xf32, #tpu.memory_space<vmem>>, vector<8x1xf32>
      %c0_19 = arith.constant 0 : index
      %c0_20 = arith.constant 0 : index
      %26 = vector.load %arg7[%c0_19, %c0_20] : memref<8x1xf32, #tpu.memory_space<vmem>>, vector<8x1xf32>
      %27 = arith.subf %24, %23 : vector<8x1xf32>
      %28 = math.exp %27 : vector<8x1xf32>
      %29 = arith.subf %26, %28 : vector<8x1xf32>
      %30 = arith.subf %25, %23 : vector<8x1xf32>
      %31 = math.exp %30 : vector<8x1xf32>
      %32 = arith.addf %29, %31 : vector<8x1xf32>
      %33 = math.log %32 : vector<8x1xf32>
      %34 = arith.addf %23, %33 : vector<8x1xf32>
      %35 = arith.subf %34, %25 : vector<8x1xf32>
      %c8_i32 = arith.constant 8 : i32
      %36 = arith.muli %arg0, %c8_i32 : i32
      %37 = tpu.iota {dimensions = array<i32: 0>} : vector<8x1xi32>
      %38 = vector.broadcast %36 : i32 to vector<8x1xi32>
      %39 = arith.addi %38, %37 : vector<8x1xi32>
      %c8_i32_21 = arith.constant 8 : i32
      %40 = vector.broadcast %c8_i32_21 : i32 to vector<8x1xi32>
      %41 = arith.cmpi slt, %39, %40 : vector<8x1xi32>
      %cst_22 = arith.constant 0.000000e+00 : f32
      %42 = vector.broadcast %cst_22 : f32 to vector<8x1xf32>
      %43 = arith.select %41, %35, %42 : vector<8x1xi1>, vector<8x1xf32>
      %44 = vector.shape_cast %43 : vector<8x1xf32> to vector<1x8x1xf32>
      %cst_23 = arith.constant dense<0.000000e+00> : vector<1xf32>
      %45 = vector.multi_reduction <add>, %44, %cst_23 [1, 2] : vector<1x8x1xf32> to vector<1xf32>
      %46 = vector.shape_cast %45 : vector<1xf32> to vector<1x1x1xf32>
      %47 = vector.extract %46[0, 0, 0] : f32 from vector<1x1x1xf32>
      %48 = vector.broadcast %47 : f32 to vector<1x128xf32>
      %c0_24 = arith.constant 0 : index
      %c0_25 = arith.constant 0 : index
      %49 = vector.load %arg5[%c0_24, %c0_25] : memref<1x128xf32, #tpu.memory_space<vmem>>, vector<1x128xf32>
      tpu.vector_store %arg5[%c0_24, %c0_25], %48 {strides = array<i32>} : memref<1x128xf32, #tpu.memory_space<vmem>>, vector<1x128xf32>,
    } else {
    }
    return
  }
  func.func @transform_0(%arg0: i32, %arg1: i32) -> (i32, i32) {
    %c0_i32 = arith.constant 0 : i32
    return %arg0, %arg1 : i32, i32
  }
  func.func @transform_1(%arg0: i32, %arg1: i32) -> (i32, i32) {
    %c0_i32 = arith.constant 0 : i32
    %c0_i32_0 = arith.constant 0 : i32
    return %arg0, %c0_i32 : i32, i32
  }
  func.func @transform_2(%arg0: i32, %arg1: i32) -> (i32, i32) {
    %c0_i32 = arith.constant 0 : i32
    %c0_i32_0 = arith.constant 0 : i32
    return %arg0, %c0_i32 : i32, i32
  }
  func.func @transform_3(%arg0: i32, %arg1: i32) -> (i32, i32) {
    %c0_i32 = arith.constant 0 : i32
    %c0_i32_0 = arith.constant 0 : i32
    return %c0_i32, %arg0 : i32, i32
  }
}

</mosaic_0001>

<bundles_post_ra>
// kernel: tpu_custom_call.1
= control target key start
LH: loop header
LB: loop body
LE: loop exit
PB: predicated region body
PF: predicated region fallthrough
CT: control target
= control target key end

     0   :  { %vm24_vm0 = vcmask 130048   ;;  %s183_s0 = inlined_call_operand.vmem [shape: f32[8,16], index: 0, kind: input, shape index: {}]   ;;  %s184_s1 = inlined_call_operand.vmem [shape: f32[8,1], index: 1, kind: input, shape index: {}]   ;;  %s185_s2 = inlined_call_operand.vmem [shape: f32[8,1], index: 2, kind: input, shape index: {}]   ;;  %s186_s3 = inlined_call_operand.hbm [shape: f32[1,128], index: 3, kind: output, shape index: {}]  }
   0x1   :  { %v22_v0 = vld [vmem:[%s183_s0] sm:$0xff] }
   0x2   :  { %8 = vsyncpa [#allocation5], 0  ;;  %v25_v1 = vsel %vm24_vm0, %v22_v0, -inf  ;;  %vm19_vm1 = vcmask 7168   ;;  %v140_v2 = vmov -inf   ;;  %v141_v3 = vmov 0  }
   0x3   :  { %26 = vmax.xlane.f32.xlu0 %v25_v1  ;;  %20 = vst.msk [vmem:[#allocation2] sm:$0xff] %vm19_vm1, %v140_v2  ;;  %v142_v4 = vmov 0.0   ;;  %v53_v16 = vld [vmem:[%s184_s1] sm:$0xff]  ;;  %s143_s1 = smov [#allocation4]  }
   0x4   :  { %107 = vset.pattern.permute.xlu0 %v141_v3  ;;  %21 = vst.msk [vmem:[#allocation3] sm:$0xff] %vm19_vm1, %v142_v4  ;;  %v54_v17 = vld [vmem:[%s185_s2] sm:$0xff]  ;;  %s93_s2 = sshll.u32 %s143_s1, 4  ;;  %s94_s2 = int_to_ptr.vmem [resolvable:$true] %s93_s2 }
   0x5   :  { %s118_s18 = scalar_lea.vmem %s94_s2, 16  ;;  %s122_s19 = scalar_lea.vmem %s94_s2, 32 }
   0x6   :  { %p119_p0 = scmp.ne.s32.totalorder %s94_s2, %s118_s18  ;;  %p123_p1 = scmp.lt.s32.totalorder %s94_s2, %s94_s2 }
   0x7   :  { %p124_p2 = scmp.lt.s32.totalorder %s122_s19, %s118_s18 }
   0x9   :  { %p125_p3 = por %p124_p2, %p123_p1 }
   0xa   :  { %v23_v5 = vld [vmem:[#allocation2] sm:$0xff] }
   0xb   :  { %v32_v23 = vld [vmem:[#allocation3] sm:$0xff]  ;;  %p126_p4 = pnand %p125_p3, %p119_p0 }
  0x8c   :  { %v27_v6 = vpop.xlane.xlu0 %26 }
  0x8d   :  { %v28_v7 = vmax.f32 %v23_v5, %v27_v6 }
  0x8f   :  { %v29_v8 = vsub.f32 %v23_v5, %v28_v7  ;;  %48 = vst.msk [vmem:[#allocation2] sm:$0xff] %vm19_vm1, %v28_v7  ;;  %36 = vperm.xlu0 %107, %v28_v7  }
  0x91   :  { %v30_v14 = vmul.f32 1.442695, %v29_v8 }
  0x96   :  { %v52_v15 = vld [vmem:[#allocation2] sm:$0xff] }
  0x97   :  { %v56_v18 = vsub.f32 %v53_v16, %v52_v15  ;;  %v60_v19 = vsub.f32 %v54_v17, %v52_v15 }
  0x99   :  { %v57_v20 = vmul.f32 1.442695, %v56_v18  ;;  %v61_v21 = vmul.f32 1.442695, %v60_v19 }
 0x10a   :  { %v37_v9 = vpop.permute.xlu0 %36 }
 0x10b   :  { %v39_v10 = vsub.f32 %v22_v0, %v37_v9 }
 0x10d   :  { %v40_v11 = vmul.f32 1.442695, %v39_v10 }
 0x10f   :  { %108 = vpow2.f32 %v40_v11 }
 0x110   :  { %110 = vpow2.f32 %v30_v14 }
 0x111   :  { %112 = vpow2.f32 %v57_v20 }
 0x112   :  { %114 = vpow2.f32 %v61_v21 }
 0x11c   :  { %v109_v12 = vpop.eup %108 }
 0x11d   :  { %v42_v13 = vsel %vm24_vm0, %v109_v12, 0.0  ;;  %v111_v22 = vpop.eup %110 }
 0x11e   :  { %43 = vadd.xlane.f32.xlu1 %v42_v13  ;;  %v33_v24 = vmul.f32 %v111_v22, %v32_v23  ;;  %v113_v27 = vpop.eup %112 }
 0x11f   :  { %v115_v30 = vpop.eup %114 }
 0x1a7   :  { %v44_v25 = vpop.xlane.xlu1 %43 }
 0x1a8   :  { %v45_v26 = vadd.f32 %v44_v25, %v33_v24 }
 0x1aa   :  { %47 = vst.msk [vmem:[#allocation3] sm:$0xff] %vm19_vm1, %v45_v26 }
 0x1b1   :  { %v55_v28 = vld [vmem:[#allocation3] sm:$0xff] }
 0x1b2   :  { %v59_v29 = vsub.f32 %v55_v28, %v113_v27 }
 0x1b4   :  { %v63_v31 = vadd.f32 %v115_v30, %v59_v29 }
 0x1b6   :  { %116 = vlog2.f32 %v63_v31 }
 0x1c3   :  { %v117_v32 = vpop.eup %116 }
 0x1c4   :  { %v65_v33 = vmul.f32 0.6931472, %v117_v32 }
 0x1c6   :  { %v66_v34 = vadd.f32 %v65_v33, %v52_v15 }
 0x1c8   :  { %v67_v35 = vsub.f32 %v66_v34, %v54_v17 }
 0x1ca   :  { %v75_v36 = vsel %vm19_vm1, %v67_v35, 0.0 }
 0x1cb   :  { %76 = vadd.xlane.f32.xlu1 %v75_v36 }
 0x254   :  { %v77_v37 = vpop.xlane.xlu1 %76 }
 0x255   :  { %v78_v38 = vrot.slane %v77_v37, 4 }
 0x257   :  { %v79_v39 = vadd.f32 %v78_v38, %v77_v37 }
 0x259   :  { %v80_v40 = vrot.slane %v79_v39, 2 }
 0x25b   :  { %v81_v41 = vadd.f32 %v80_v40, %v79_v39 }
 0x25d   :  { %v82_v42 = vrot.slane %v81_v41, 1 }
 0x25f   :  { %v83_v43 = vadd.f32 %v82_v42, %v81_v41 }
 0x261   :  { %101 = vpush %v83_v43 }
 0x292   :  { %s102_s17 = spop %101 }
 0x293   :  { %v85_v44 = vstv %s102_s17 }
 0x294   :  { %86 = vst [vmem:[#allocation4] sm:$0x1] %v85_v44 }
 0x295   :  { %129 = shalt.err (!%p126_p4)
}
 0x296   :  { %96 = dma.vmem_to_hbm [thread:$0]  %s94_s2, 16, %s186_s3, [#allocation5]  }
 0x297   :  { %138 = dma.done.wait [#allocation5], 16  }
 0x298   :  { %139 = vsyncadd [#allocation5], 4294967280 }
 0x299   :  { %100 = vsyncpa [#allocation5], 1 }

</bundles_post_ra>
